<compile_context>
chip_gen: v7x
topology: tpu7x:2x2x1
jax: 0.10.0
libtpu: 0.0.40
codegen_flags: <defaults>
</compile_context>

<pallas_src>
import jax
import jax.numpy as jnp
import numpy as np
from jax import lax
from jax.experimental import pallas as pl
from jax.experimental.pallas import tpu as pltpu


# ----------------------------- Pallas kernel ------------------------------- #

def _make_kernel(H, W):
    n = H * W

    def kernel(x_ref, w9_ref, wq_ref, wk_ref, wv_ref, wp_ref, pb_ref,
               resc_ref, abias_ref, mask_ref, o_ref):
        """Fused Attention forward for one batch element (NCHW-flat layout).

        x_ref   : (1, C, n)   input, n = H*W on the lane axis (f32)
        w9_ref  : (9, C, 1)   depthwise 3x3 taps as per-channel columns (f32)
        wq/k/v  : (HD, C)     fused projection weights (bf16)
        wp_ref  : (C, HD)     output projection weight (bf16)
        pb_ref  : (C, 1)      output projection bias (f32)
        resc_ref: (HD, 1)     per-row (= per-head) rescale (f32)
        abias_ref:(HD, HD)    0 inside a head's DxD block, -1e30 elsewhere (f32)
        mask_ref: (9, 1, n)   conv-tap validity masks over flattened tokens (f32)
        o_ref   : (1, C, n)   output, NCHW-flat
        """
        x = x_ref[0]                                         # (C, n) f32

        # --- depthwise 3x3 conv (pad=1) + residual, in (C, n) layout ---------
        # center tap + residual folded: x * (1 + w_center)
        acc = x * (w9_ref[4] + 1.0)
        for dy in range(3):
            for dx in range(3):
                if dy == 1 and dx == 1:
                    continue
                t = dy * 3 + dx
                off = (dy - 1) * W + (dx - 1)                # token offset of tap
                shifted = pltpu.roll(x, shift=(-off) % n, axis=1)
                acc = acc + (shifted * mask_ref[t]) * w9_ref[t]

        tok = acc.astype(jnp.bfloat16)                       # MXU operand

        # --- fused Q/K/V projections (all heads in one matmul each) ----------
        q = jnp.dot(wq_ref[...], tok, preferred_element_type=jnp.float32)  # (HD,n)
        k = jnp.dot(wk_ref[...], tok, preferred_element_type=jnp.float32)
        v = jnp.dot(wv_ref[...], tok, preferred_element_type=jnp.float32)

        def l2_rows(t2):   # F.normalize(dim=-1): per-row L2 over tokens, clamp 1e-12
            ssq = jnp.sum(t2 * t2, axis=1, keepdims=True)
            return t2 * lax.rsqrt(jnp.maximum(ssq, 1e-24))

        qn = l2_rows(q).astype(jnp.bfloat16)
        kn = l2_rows(k).astype(jnp.bfloat16)

        # --- all heads' grams as one (HD, HD) matmul; block-masked softmax ----
        g = lax.dot_general(kn, qn, (((1,), (1,)), ((), ())),
                            preferred_element_type=jnp.float32)     # (HD, HD)
        g = g * resc_ref[...] + abias_ref[...]
        g = g - jnp.max(g, axis=-1, keepdims=True)
        p = jnp.exp(g)                                               # block-diag
        p = p * pl.reciprocal(jnp.sum(p, axis=-1, keepdims=True), approx=True)

        # --- epilogue: out^T = (Wp @ A) @ V + b  -> written directly as NCHW --
        w_eff = jnp.dot(wp_ref[...], p.astype(jnp.bfloat16),
                        preferred_element_type=jnp.float32)          # (C, HD)
        out = jnp.dot(w_eff.astype(jnp.bfloat16), v.astype(jnp.bfloat16),
                      preferred_element_type=jnp.float32)            # (C, n)
        out = out + pb_ref[...]
        o_ref[0] = out.astype(o_ref.dtype)

    return kernel


# ------------------------------- wrapper ------------------------------------ #

def attention_forward(x_nchw, w_pos, w_q, w_k, w_v, rescale, w_proj, b_proj,
                      *, heads, dim_head):
    """PyTorch-parameter-compatible wrapper.

    x_nchw : (B, C, H, W)
    w_pos  : (C, 1, 3, 3)          depthwise Conv2d weight (groups=C, no bias)
    w_q/k/v: (heads*dim_head, C)   Linear weights (no bias)
    rescale: (heads, 1, 1)
    w_proj : (C, heads*dim_head), b_proj: (C,)
    returns (B, C, H, W)
    """
    B, C, H, W = x_nchw.shape
    D = dim_head
    HD = heads * D
    n = H * W

    # NCHW kept; trailing-dim merge is a free (metadata-only) reshape in HBM.
    x_flat = x_nchw.reshape(B, C, n).astype(jnp.float32)

    # depthwise conv taps as 9 per-channel columns: w9[t, c, 0] = w_pos[c,0,dy,dx]
    w9 = jnp.transpose(w_pos.reshape(C, 9), (1, 0)).reshape(9, C, 1).astype(jnp.float32)

    wq = w_q.astype(jnp.bfloat16)
    wk = w_k.astype(jnp.bfloat16)
    wv = w_v.astype(jnp.bfloat16)
    wp = w_proj.astype(jnp.bfloat16)
    pb = b_proj.reshape(C, 1).astype(jnp.float32)
    resc_row = jnp.repeat(rescale.reshape(heads), D).reshape(HD, 1).astype(jnp.float32)

    # additive softmax mask: 0 inside each head's DxD diagonal block, -1e30 off-block
    hid = np.arange(HD) // D
    abias = jnp.asarray(np.where(hid[:, None] == hid[None, :], 0.0, -1e30),
                        dtype=np.float32)

    # 3x3 tap validity masks over the flattened (lane) token axis
    yy, xx = np.meshgrid(np.arange(H), np.arange(W), indexing="ij")
    yy = yy.reshape(-1)
    xx = xx.reshape(-1)
    m = np.zeros((9, 1, n), np.float32)
    for dy in range(3):
        for dx in range(3):
            ok = ((yy + dy - 1 >= 0) & (yy + dy - 1 < H) &
                  (xx + dx - 1 >= 0) & (xx + dx - 1 < W))
            m[dy * 3 + dx, 0, :] = ok.astype(np.float32)
    masks = jnp.asarray(m)

    # VMEM budget: double-buffered in/out/mask blocks + live f32 intermediates.
    f32b = 4
    blocks = 2 * (C * n + C * n + 9 * n) * f32b
    interm = (6 * HD * n + 3 * C * n) * f32b
    vmem_limit = int(min(max(blocks + interm + (4 << 20), 16 << 20), 64 << 20))

    kernel = _make_kernel(H, W)

    out_flat = pl.pallas_call(
        kernel,
        out_shape=jax.ShapeDtypeStruct((B, C, n), jnp.float32),
        grid=(B,),
        in_specs=[
            pl.BlockSpec((1, C, n), lambda b: (b, 0, 0)),
            pl.BlockSpec((9, C, 1), lambda b: (0, 0, 0)),
            pl.BlockSpec((HD, C), lambda b: (0, 0)),
            pl.BlockSpec((HD, C), lambda b: (0, 0)),
            pl.BlockSpec((HD, C), lambda b: (0, 0)),
            pl.BlockSpec((C, HD), lambda b: (0, 0)),
            pl.BlockSpec((C, 1), lambda b: (0, 0)),
            pl.BlockSpec((HD, 1), lambda b: (0, 0)),
            pl.BlockSpec((HD, HD), lambda b: (0, 0)),
            pl.BlockSpec((9, 1, n), lambda b: (0, 0, 0)),
        ],
        out_specs=pl.BlockSpec((1, C, n), lambda b: (b, 0, 0)),
        compiler_params=pltpu.CompilerParams(
            dimension_semantics=("parallel",),
            vmem_limit_bytes=vmem_limit),
    )(x_flat, w9, wq, wk, wv, wp, pb, resc_row, abias, masks)

    # free reshape back to NCHW
    return out_flat.reshape(B, C, H, W)


# ------------------------------ reference ------------------------------------ #

def reference(x_nchw, w_pos, w_q, w_k, w_v, rescale, w_proj, b_proj,
              *, heads, dim_head):
    hp = lax.Precision.HIGHEST
    B, C, H, W = x_nchw.shape
    x_nhwc = jnp.transpose(x_nchw, (0, 2, 3, 1)).astype(jnp.float32)
    wdw = jnp.transpose(w_pos, (2, 3, 1, 0)).astype(jnp.float32)     # (3,3,1,C) HWIO
    pos = lax.conv_general_dilated(
        x_nhwc, wdw, (1, 1), ((1, 1), (1, 1)),
        dimension_numbers=("NHWC", "HWIO", "NHWC"),
        feature_group_count=C, precision=hp)
    xi = x_nhwc + pos
    xt = xi.reshape(B, H * W, C)
    q = jnp.einsum("bnc,fc->bnf", xt, w_q, precision=hp)
    k = jnp.einsum("bnc,fc->bnf", xt, w_k, precision=hp)
    v = jnp.einsum("bnc,fc->bnf", xt, w_v, precision=hp)

    def split(t):  # b n (h d) -> b h d n
        return jnp.transpose(t.reshape(B, H * W, heads, dim_head), (0, 2, 3, 1))

    q, k, v = split(q), split(k), split(v)

    def l2n(t):
        return t / jnp.maximum(jnp.sqrt(jnp.sum(t * t, axis=-1, keepdims=True)), 1e-12)

    q, k = l2n(q), l2n(k)
    attn = jnp.einsum("bhdn,bhen->bhde", k, q, precision=hp)
    attn = attn * rescale.reshape(1, heads, 1, 1)
    attn = jax.nn.softmax(attn, axis=-1)
    xo = jnp.einsum("bhde,bhen->bhdn", attn, v, precision=hp)
    xo = jnp.transpose(xo, (0, 3, 1, 2)).reshape(B, H * W, heads * dim_head)
    out = jnp.einsum("bnf,cf->bnc", xo, w_proj, precision=hp) + b_proj
    return jnp.transpose(out.reshape(B, H, W, C), (0, 3, 1, 2))


if __name__ == "__main__":
    # Small shapes consistent with the module: dim=16, heads=2, dim_head=8,
    # 16x16 feature map (H*W = 256 tokens -> lane-dense).
    B, dim, heads, dim_head, H, W = 2, 16, 2, 8, 16, 16
    HD = heads * dim_head

    key = jax.random.PRNGKey(0)
    ks = jax.random.split(key, 8)
    x = jax.random.normal(ks[0], (B, dim, H, W), jnp.float32)
    w_pos = jax.random.normal(ks[1], (dim, 1, 3, 3), jnp.float32) * 0.1
    w_q = jax.random.normal(ks[2], (HD, dim), jnp.float32) * 0.1
    w_k = jax.random.normal(ks[3], (HD, dim), jnp.float32) * 0.1
    w_v = jax.random.normal(ks[4], (HD, dim), jnp.float32) * 0.1
    rescale = 1.0 + 0.1 * jax.random.normal(ks[5], (heads, 1, 1), jnp.float32)
    w_proj = jax.random.normal(ks[6], (dim, HD), jnp.float32) * 0.1
    b_proj = jax.random.normal(ks[7], (dim,), jnp.float32) * 0.1

    out = attention_forward(x, w_pos, w_q, w_k, w_v, rescale, w_proj, b_proj,
                            heads=heads, dim_head=dim_head)
    out = jax.block_until_ready(out)

    ref = jax.block_until_ready(
        reference(x, w_pos, w_q, w_k, w_v, rescale, w_proj, b_proj,
                  heads=heads, dim_head=dim_head))

    # Kernel uses bf16 MXU operands with f32 accumulation; reference is HIGHEST.
    np.testing.assert_allclose(np.asarray(out), np.asarray(ref), rtol=2e-2, atol=1e-2)
    assert out.shape == (B, dim, H, W)

    print("KERNEL_OK")
</pallas_src>

<mosaic_0001>
module attributes {stable_mosaic.version = 11 : i64} {
  func.func @kernel(%arg0: i32, %arg1: memref<1x16x256xf32, #tpu.memory_space<vmem>>, %arg2: memref<9x16x1xf32, #tpu.memory_space<vmem>>, %arg3: memref<16x16xbf16, #tpu.memory_space<vmem>>, %arg4: memref<16x16xbf16, #tpu.memory_space<vmem>>, %arg5: memref<16x16xbf16, #tpu.memory_space<vmem>>, %arg6: memref<16x16xbf16, #tpu.memory_space<vmem>>, %arg7: memref<16x1xf32, #tpu.memory_space<vmem>>, %arg8: memref<16x1xf32, #tpu.memory_space<vmem>>, %arg9: memref<16x16xf32, #tpu.memory_space<vmem>>, %arg10: memref<9x1x256xf32, #tpu.memory_space<vmem>>, %arg11: memref<1x16x256xf32, #tpu.memory_space<vmem>>) attributes {dimension_semantics = [#tpu.dimension_semantics<parallel>], iteration_bounds = array<i64: 2>, scalar_prefetch = 0 : i64, scratch_operands = 0 : i64, tpu.core_type = #tpu.core_type<tc>, window_params = [{transform_indices = @transform_0, window_bounds = array<i64: 1, 16, 256>}, {pipeline_mode = #tpu.pipeline_mode<synchronous>, transform_indices = @transform_1, window_bounds = array<i64: 9, 16, 1>}, {pipeline_mode = #tpu.pipeline_mode<synchronous>, transform_indices = @transform_2, window_bounds = array<i64: 16, 16>}, {pipeline_mode = #tpu.pipeline_mode<synchronous>, transform_indices = @transform_3, window_bounds = array<i64: 16, 16>}, {pipeline_mode = #tpu.pipeline_mode<synchronous>, transform_indices = @transform_4, window_bounds = array<i64: 16, 16>}, {pipeline_mode = #tpu.pipeline_mode<synchronous>, transform_indices = @transform_5, window_bounds = array<i64: 16, 16>}, {pipeline_mode = #tpu.pipeline_mode<synchronous>, transform_indices = @transform_6, window_bounds = array<i64: 16, 1>}, {pipeline_mode = #tpu.pipeline_mode<synchronous>, transform_indices = @transform_7, window_bounds = array<i64: 16, 1>}, {pipeline_mode = #tpu.pipeline_mode<synchronous>, transform_indices = @transform_8, window_bounds = array<i64: 16, 16>}, {pipeline_mode = #tpu.pipeline_mode<synchronous>, transform_indices = @transform_9, window_bounds = array<i64: 9, 1, 256>}, {transform_indices = @transform_10, window_bounds = array<i64: 1, 16, 256>}]} {
    %c0 = arith.constant 0 : index
    %c0_0 = arith.constant 0 : index
    %c0_1 = arith.constant 0 : index
    %0 = vector.load %arg1[%c0, %c0_0, %c0_1] : memref<1x16x256xf32, #tpu.memory_space<vmem>>, vector<1x16x256xf32>
    %1 = vector.shape_cast %0 : vector<1x16x256xf32> to vector<16x256xf32>
    %c4 = arith.constant 4 : index
    %c0_2 = arith.constant 0 : index
    %c0_3 = arith.constant 0 : index
    %2 = vector.load %arg2[%c4, %c0_2, %c0_3] : memref<9x16x1xf32, #tpu.memory_space<vmem>>, vector<1x16x1xf32>
    %3 = vector.shape_cast %2 : vector<1x16x1xf32> to vector<16x1xf32>
    %cst = arith.constant 1.000000e+00 : f32
    %4 = vector.broadcast %cst : f32 to vector<16x1xf32>
    %5 = arith.addf %3, %4 : vector<16x1xf32>
    %6 = vector.broadcast %5 : vector<16x1xf32> to vector<16x256xf32>
    %7 = arith.mulf %1, %6 : vector<16x256xf32>
    %c17_i32 = arith.constant 17 : i32
    %8 = tpu.dynamic_rotate %1 by %c17_i32 dim 1 : vector<16x256xf32>, i32 -> vector<16x256xf32>
    %c0_4 = arith.constant 0 : index
    %c0_5 = arith.constant 0 : index
    %c0_6 = arith.constant 0 : index
    %9 = vector.load %arg10[%c0_4, %c0_5, %c0_6] : memref<9x1x256xf32, #tpu.memory_space<vmem>>, vector<1x1x256xf32>
    %10 = vector.shape_cast %9 : vector<1x1x256xf32> to vector<1x256xf32>
    %11 = vector.broadcast %10 : vector<1x256xf32> to vector<16x256xf32>
    %12 = arith.mulf %8, %11 : vector<16x256xf32>
    %c0_7 = arith.constant 0 : index
    %c0_8 = arith.constant 0 : index
    %c0_9 = arith.constant 0 : index
    %13 = vector.load %arg2[%c0_7, %c0_8, %c0_9] : memref<9x16x1xf32, #tpu.memory_space<vmem>>, vector<1x16x1xf32>
    %14 = vector.shape_cast %13 : vector<1x16x1xf32> to vector<16x1xf32>
    %15 = vector.broadcast %14 : vector<16x1xf32> to vector<16x256xf32>
    %16 = arith.mulf %12, %15 : vector<16x256xf32>
    %17 = arith.addf %7, %16 : vector<16x256xf32>
    %c16_i32 = arith.constant 16 : i32
    %18 = tpu.dynamic_rotate %1 by %c16_i32 dim 1 : vector<16x256xf32>, i32 -> vector<16x256xf32>
    %c1 = arith.constant 1 : index
    %c0_10 = arith.constant 0 : index
    %c0_11 = arith.constant 0 : index
    %19 = vector.load %arg10[%c1, %c0_10, %c0_11] : memref<9x1x256xf32, #tpu.memory_space<vmem>>, vector<1x1x256xf32>
    %20 = vector.shape_cast %19 : vector<1x1x256xf32> to vector<1x256xf32>
    %21 = vector.broadcast %20 : vector<1x256xf32> to vector<16x256xf32>
    %22 = arith.mulf %18, %21 : vector<16x256xf32>
    %c1_12 = arith.constant 1 : index
    %c0_13 = arith.constant 0 : index
    %c0_14 = arith.constant 0 : index
    %23 = vector.load %arg2[%c1_12, %c0_13, %c0_14] : memref<9x16x1xf32, #tpu.memory_space<vmem>>, vector<1x16x1xf32>
    %24 = vector.shape_cast %23 : vector<1x16x1xf32> to vector<16x1xf32>
    %25 = vector.broadcast %24 : vector<16x1xf32> to vector<16x256xf32>
    %26 = arith.mulf %22, %25 : vector<16x256xf32>
    %27 = arith.addf %17, %26 : vector<16x256xf32>
    %c15_i32 = arith.constant 15 : i32
    %28 = tpu.dynamic_rotate %1 by %c15_i32 dim 1 : vector<16x256xf32>, i32 -> vector<16x256xf32>
    %c2 = arith.constant 2 : index
    %c0_15 = arith.constant 0 : index
    %c0_16 = arith.constant 0 : index
    %29 = vector.load %arg10[%c2, %c0_15, %c0_16] : memref<9x1x256xf32, #tpu.memory_space<vmem>>, vector<1x1x256xf32>
    %30 = vector.shape_cast %29 : vector<1x1x256xf32> to vector<1x256xf32>
    %31 = vector.broadcast %30 : vector<1x256xf32> to vector<16x256xf32>
    %32 = arith.mulf %28, %31 : vector<16x256xf32>
    %c2_17 = arith.constant 2 : index
    %c0_18 = arith.constant 0 : index
    %c0_19 = arith.constant 0 : index
    %33 = vector.load %arg2[%c2_17, %c0_18, %c0_19] : memref<9x16x1xf32, #tpu.memory_space<vmem>>, vector<1x16x1xf32>
    %34 = vector.shape_cast %33 : vector<1x16x1xf32> to vector<16x1xf32>
    %35 = vector.broadcast %34 : vector<16x1xf32> to vector<16x256xf32>
    %36 = arith.mulf %32, %35 : vector<16x256xf32>
    %37 = arith.addf %27, %36 : vector<16x256xf32>
    %c1_i32 = arith.constant 1 : i32
    %38 = tpu.dynamic_rotate %1 by %c1_i32 dim 1 : vector<16x256xf32>, i32 -> vector<16x256xf32>
    %c3 = arith.constant 3 : index
    %c0_20 = arith.constant 0 : index
    %c0_21 = arith.constant 0 : index
    %39 = vector.load %arg10[%c3, %c0_20, %c0_21] : memref<9x1x256xf32, #tpu.memory_space<vmem>>, vector<1x1x256xf32>
    %40 = vector.shape_cast %39 : vector<1x1x256xf32> to vector<1x256xf32>
    %41 = vector.broadcast %40 : vector<1x256xf32> to vector<16x256xf32>
    %42 = arith.mulf %38, %41 : vector<16x256xf32>
    %c3_22 = arith.constant 3 : index
    %c0_23 = arith.constant 0 : index
    %c0_24 = arith.constant 0 : index
    %43 = vector.load %arg2[%c3_22, %c0_23, %c0_24] : memref<9x16x1xf32, #tpu.memory_space<vmem>>, vector<1x16x1xf32>
    %44 = vector.shape_cast %43 : vector<1x16x1xf32> to vector<16x1xf32>
    %45 = vector.broadcast %44 : vector<16x1xf32> to vector<16x256xf32>
    %46 = arith.mulf %42, %45 : vector<16x256xf32>
    %47 = arith.addf %37, %46 : vector<16x256xf32>
    %c255_i32 = arith.constant 255 : i32
    %48 = tpu.dynamic_rotate %1 by %c255_i32 dim 1 : vector<16x256xf32>, i32 -> vector<16x256xf32>
    %c5 = arith.constant 5 : index
    %c0_25 = arith.constant 0 : index
    %c0_26 = arith.constant 0 : index
    %49 = vector.load %arg10[%c5, %c0_25, %c0_26] : memref<9x1x256xf32, #tpu.memory_space<vmem>>, vector<1x1x256xf32>
    %50 = vector.shape_cast %49 : vector<1x1x256xf32> to vector<1x256xf32>
    %51 = vector.broadcast %50 : vector<1x256xf32> to vector<16x256xf32>
    %52 = arith.mulf %48, %51 : vector<16x256xf32>
    %c5_27 = arith.constant 5 : index
    %c0_28 = arith.constant 0 : index
    %c0_29 = arith.constant 0 : index
    %53 = vector.load %arg2[%c5_27, %c0_28, %c0_29] : memref<9x16x1xf32, #tpu.memory_space<vmem>>, vector<1x16x1xf32>
    %54 = vector.shape_cast %53 : vector<1x16x1xf32> to vector<16x1xf32>
    %55 = vector.broadcast %54 : vector<16x1xf32> to vector<16x256xf32>
    %56 = arith.mulf %52, %55 : vector<16x256xf32>
    %57 = arith.addf %47, %56 : vector<16x256xf32>
    %c241_i32 = arith.constant 241 : i32
    %58 = tpu.dynamic_rotate %1 by %c241_i32 dim 1 : vector<16x256xf32>, i32 -> vector<16x256xf32>
    %c6 = arith.constant 6 : index
    %c0_30 = arith.constant 0 : index
    %c0_31 = arith.constant 0 : index
    %59 = vector.load %arg10[%c6, %c0_30, %c0_31] : memref<9x1x256xf32, #tpu.memory_space<vmem>>, vector<1x1x256xf32>
    %60 = vector.shape_cast %59 : vector<1x1x256xf32> to vector<1x256xf32>
    %61 = vector.broadcast %60 : vector<1x256xf32> to vector<16x256xf32>
    %62 = arith.mulf %58, %61 : vector<16x256xf32>
    %c6_32 = arith.constant 6 : index
    %c0_33 = arith.constant 0 : index
    %c0_34 = arith.constant 0 : index
    %63 = vector.load %arg2[%c6_32, %c0_33, %c0_34] : memref<9x16x1xf32, #tpu.memory_space<vmem>>, vector<1x16x1xf32>
    %64 = vector.shape_cast %63 : vector<1x16x1xf32> to vector<16x1xf32>
    %65 = vector.broadcast %64 : vector<16x1xf32> to vector<16x256xf32>
    %66 = arith.mulf %62, %65 : vector<16x256xf32>
    %67 = arith.addf %57, %66 : vector<16x256xf32>
    %c240_i32 = arith.constant 240 : i32
    %68 = tpu.dynamic_rotate %1 by %c240_i32 dim 1 : vector<16x256xf32>, i32 -> vector<16x256xf32>
    %c7 = arith.constant 7 : index
    %c0_35 = arith.constant 0 : index
    %c0_36 = arith.constant 0 : index
    %69 = vector.load %arg10[%c7, %c0_35, %c0_36] : memref<9x1x256xf32, #tpu.memory_space<vmem>>, vector<1x1x256xf32>
    %70 = vector.shape_cast %69 : vector<1x1x256xf32> to vector<1x256xf32>
    %71 = vector.broadcast %70 : vector<1x256xf32> to vector<16x256xf32>
    %72 = arith.mulf %68, %71 : vector<16x256xf32>
    %c7_37 = arith.constant 7 : index
    %c0_38 = arith.constant 0 : index
    %c0_39 = arith.constant 0 : index
    %73 = vector.load %arg2[%c7_37, %c0_38, %c0_39] : memref<9x16x1xf32, #tpu.memory_space<vmem>>, vector<1x16x1xf32>
    %74 = vector.shape_cast %73 : vector<1x16x1xf32> to vector<16x1xf32>
    %75 = vector.broadcast %74 : vector<16x1xf32> to vector<16x256xf32>
    %76 = arith.mulf %72, %75 : vector<16x256xf32>
    %77 = arith.addf %67, %76 : vector<16x256xf32>
    %c239_i32 = arith.constant 239 : i32
    %78 = tpu.dynamic_rotate %1 by %c239_i32 dim 1 : vector<16x256xf32>, i32 -> vector<16x256xf32>
    %c8 = arith.constant 8 : index
    %c0_40 = arith.constant 0 : index
    %c0_41 = arith.constant 0 : index
    %79 = vector.load %arg10[%c8, %c0_40, %c0_41] : memref<9x1x256xf32, #tpu.memory_space<vmem>>, vector<1x1x256xf32>
    %80 = vector.shape_cast %79 : vector<1x1x256xf32> to vector<1x256xf32>
    %81 = vector.broadcast %80 : vector<1x256xf32> to vector<16x256xf32>
    %82 = arith.mulf %78, %81 : vector<16x256xf32>
    %c8_42 = arith.constant 8 : index
    %c0_43 = arith.constant 0 : index
    %c0_44 = arith.constant 0 : index
    %83 = vector.load %arg2[%c8_42, %c0_43, %c0_44] : memref<9x16x1xf32, #tpu.memory_space<vmem>>, vector<1x16x1xf32>
    %84 = vector.shape_cast %83 : vector<1x16x1xf32> to vector<16x1xf32>
    %85 = vector.broadcast %84 : vector<16x1xf32> to vector<16x256xf32>
    %86 = arith.mulf %82, %85 : vector<16x256xf32>
    %87 = arith.addf %77, %86 : vector<16x256xf32>
    %88 = arith.truncf %87 : vector<16x256xf32> to vector<16x256xbf16>
    %c0_45 = arith.constant 0 : index
    %c0_46 = arith.constant 0 : index
    %89 = vector.load %arg3[%c0_45, %c0_46] : memref<16x16xbf16, #tpu.memory_space<vmem>>, vector<16x16xbf16>
    %cst_47 = arith.constant dense<0.000000e+00> : vector<16x256xf32>
    %90 = tpu.matmul %89, %88, %cst_47 {dimension_numbers = #tpu.dot_dimension_numbers<[1], [0], [0], [1], [0, 0, 1, 1], [], []>} : vector<16x16xbf16>, vector<16x256xbf16>, vector<16x256xf32> -> vector<16x256xf32>
    %c0_48 = arith.constant 0 : index
    %c0_49 = arith.constant 0 : index
    %91 = vector.load %arg4[%c0_48, %c0_49] : memref<16x16xbf16, #tpu.memory_space<vmem>>, vector<16x16xbf16>
    %cst_50 = arith.constant dense<0.000000e+00> : vector<16x256xf32>
    %92 = tpu.matmul %91, %88, %cst_50 {dimension_numbers = #tpu.dot_dimension_numbers<[1], [0], [0], [1], [0, 0, 1, 1], [], []>} : vector<16x16xbf16>, vector<16x256xbf16>, vector<16x256xf32> -> vector<16x256xf32>
    %c0_51 = arith.constant 0 : index
    %c0_52 = arith.constant 0 : index
    %93 = vector.load %arg5[%c0_51, %c0_52] : memref<16x16xbf16, #tpu.memory_space<vmem>>, vector<16x16xbf16>
    %cst_53 = arith.constant dense<0.000000e+00> : vector<16x256xf32>
    %94 = tpu.matmul %93, %88, %cst_53 {dimension_numbers = #tpu.dot_dimension_numbers<[1], [0], [0], [1], [0, 0, 1, 1], [], []>} : vector<16x16xbf16>, vector<16x256xbf16>, vector<16x256xf32> -> vector<16x256xf32>
    %95 = arith.mulf %90, %90 : vector<16x256xf32>
    %cst_54 = arith.constant dense<0.000000e+00> : vector<16xf32>
    %96 = vector.multi_reduction <add>, %95, %cst_54 [1] : vector<16x256xf32> to vector<16xf32>
    %97 = vector.shape_cast %96 : vector<16xf32> to vector<16x1xf32>
    %cst_55 = arith.constant 1.000000e-24 : f32
    %98 = vector.broadcast %cst_55 : f32 to vector<16x1xf32>
    %99 = arith.maximumf %97, %98 : vector<16x1xf32>
    %100 = math.rsqrt %99 : vector<16x1xf32>
    %101 = vector.broadcast %100 : vector<16x1xf32> to vector<16x256xf32>
    %102 = arith.mulf %90, %101 : vector<16x256xf32>
    %103 = arith.truncf %102 : vector<16x256xf32> to vector<16x256xbf16>
    %104 = arith.mulf %92, %92 : vector<16x256xf32>
    %cst_56 = arith.constant dense<0.000000e+00> : vector<16xf32>
    %105 = vector.multi_reduction <add>, %104, %cst_56 [1] : vector<16x256xf32> to vector<16xf32>
    %106 = vector.shape_cast %105 : vector<16xf32> to vector<16x1xf32>
    %cst_57 = arith.constant 1.000000e-24 : f32
    %107 = vector.broadcast %cst_57 : f32 to vector<16x1xf32>
    %108 = arith.maximumf %106, %107 : vector<16x1xf32>
    %109 = math.rsqrt %108 : vector<16x1xf32>
    %110 = vector.broadcast %109 : vector<16x1xf32> to vector<16x256xf32>
    %111 = arith.mulf %92, %110 : vector<16x256xf32>
    %112 = arith.truncf %111 : vector<16x256xf32> to vector<16x256xbf16>
    %cst_58 = arith.constant dense<0.000000e+00> : vector<16x16xf32>
    %113 = tpu.matmul %112, %103, %cst_58 {dimension_numbers = #tpu.dot_dimension_numbers<[1], [1], [0], [0], [0, 0, 1, 0], [], []>} : vector<16x256xbf16>, vector<16x256xbf16>, vector<16x16xf32> -> vector<16x16xf32>
    %c0_59 = arith.constant 0 : index
    %c0_60 = arith.constant 0 : index
    %114 = vector.load %arg8[%c0_59, %c0_60] : memref<16x1xf32, #tpu.memory_space<vmem>>, vector<16x1xf32>
    %115 = vector.broadcast %114 : vector<16x1xf32> to vector<16x16xf32>
    %116 = arith.mulf %113, %115 : vector<16x16xf32>
    %c0_61 = arith.constant 0 : index
    %c0_62 = arith.constant 0 : index
    %117 = vector.load %arg9[%c0_61, %c0_62] : memref<16x16xf32, #tpu.memory_space<vmem>>, vector<16x16xf32>
    %118 = arith.addf %116, %117 : vector<16x16xf32>
    %cst_63 = arith.constant dense<0xFF800000> : vector<16xf32>
    %119 = vector.multi_reduction <maximumf>, %118, %cst_63 [1] : vector<16x16xf32> to vector<16xf32>
    %120 = vector.shape_cast %119 : vector<16xf32> to vector<16x1xf32>
    %121 = vector.broadcast %120 : vector<16x1xf32> to vector<16x16xf32>
    %122 = arith.subf %118, %121 : vector<16x16xf32>
    %123 = math.exp %122 : vector<16x16xf32>
    %cst_64 = arith.constant dense<0.000000e+00> : vector<16xf32>
    %124 = vector.multi_reduction <add>, %123, %cst_64 [1] : vector<16x16xf32> to vector<16xf32>
    %125 = vector.shape_cast %124 : vector<16xf32> to vector<16x1xf32>
    %126 = tpu.reciprocal %125 {approx = true} : vector<16x1xf32> -> vector<16x1xf32>
    %127 = vector.broadcast %126 : vector<16x1xf32> to vector<16x16xf32>
    %128 = arith.mulf %123, %127 : vector<16x16xf32>
    %c0_65 = arith.constant 0 : index
    %c0_66 = arith.constant 0 : index
    %129 = vector.load %arg6[%c0_65, %c0_66] : memref<16x16xbf16, #tpu.memory_space<vmem>>, vector<16x16xbf16>
    %130 = arith.truncf %128 : vector<16x16xf32> to vector<16x16xbf16>
    %cst_67 = arith.constant dense<0.000000e+00> : vector<16x16xf32>
    %131 = tpu.matmul %129, %130, %cst_67 {dimension_numbers = #tpu.dot_dimension_numbers<[1], [0], [0], [1], [0, 0, 1, 1], [], []>} : vector<16x16xbf16>, vector<16x16xbf16>, vector<16x16xf32> -> vector<16x16xf32>
    %132 = arith.truncf %131 : vector<16x16xf32> to vector<16x16xbf16>
    %133 = arith.truncf %94 : vector<16x256xf32> to vector<16x256xbf16>
    %cst_68 = arith.constant dense<0.000000e+00> : vector<16x256xf32>
    %134 = tpu.matmul %132, %133, %cst_68 {dimension_numbers = #tpu.dot_dimension_numbers<[1], [0], [0], [1], [0, 0, 1, 1], [], []>} : vector<16x16xbf16>, vector<16x256xbf16>, vector<16x256xf32> -> vector<16x256xf32>
    %c0_69 = arith.constant 0 : index
    %c0_70 = arith.constant 0 : index
    %135 = vector.load %arg7[%c0_69, %c0_70] : memref<16x1xf32, #tpu.memory_space<vmem>>, vector<16x1xf32>
    %136 = vector.broadcast %135 : vector<16x1xf32> to vector<16x256xf32>
    %137 = arith.addf %134, %136 : vector<16x256xf32>
    %c0_71 = arith.constant 0 : index
    %c0_72 = arith.constant 0 : index
    %c0_73 = arith.constant 0 : index
    %138 = vector.load %arg11[%c0_71, %c0_72, %c0_73] : memref<1x16x256xf32, #tpu.memory_space<vmem>>, vector<1x16x256xf32>
    %139 = vector.shape_cast %138 : vector<1x16x256xf32> to vector<16x256xf32>
    %140 = vector.shape_cast %137 : vector<16x256xf32> to vector<1x16x256xf32>
    tpu.vector_store %arg11[%c0_71, %c0_72, %c0_73], %140 {strides = array<i32>} : memref<1x16x256xf32, #tpu.memory_space<vmem>>, vector<1x16x256xf32>,
    return
  }
  func.func @transform_0(%arg0: i32) -> (i32, i32, i32) {
    %c0_i32 = arith.constant 0 : i32
    %c0_i32_0 = arith.constant 0 : i32
    %c0_i32_1 = arith.constant 0 : i32
    return %arg0, %c0_i32, %c0_i32_0 : i32, i32, i32
  }
  func.func @transform_1(%arg0: i32) -> (i32, i32, i32) {
    %c0_i32 = arith.constant 0 : i32
    %c0_i32_0 = arith.constant 0 : i32
    %c0_i32_1 = arith.constant 0 : i32
    %c0_i32_2 = arith.constant 0 : i32
    return %c0_i32, %c0_i32_0, %c0_i32_1 : i32, i32, i32
  }
  func.func @transform_2(%arg0: i32) -> (i32, i32) {
    %c0_i32 = arith.constant 0 : i32
    %c0_i32_0 = arith.constant 0 : i32
    %c0_i32_1 = arith.constant 0 : i32
    return %c0_i32, %c0_i32_0 : i32, i32
  }
  func.func @transform_3(%arg0: i32) -> (i32, i32) {
    %c0_i32 = arith.constant 0 : i32
    %c0_i32_0 = arith.constant 0 : i32
    %c0_i32_1 = arith.constant 0 : i32
    return %c0_i32, %c0_i32_0 : i32, i32
  }
  func.func @transform_4(%arg0: i32) -> (i32, i32) {
    %c0_i32 = arith.constant 0 : i32
    %c0_i32_0 = arith.constant 0 : i32
    %c0_i32_1 = arith.constant 0 : i32
    return %c0_i32, %c0_i32_0 : i32, i32
  }
  func.func @transform_5(%arg0: i32) -> (i32, i32) {
    %c0_i32 = arith.constant 0 : i32
    %c0_i32_0 = arith.constant 0 : i32
    %c0_i32_1 = arith.constant 0 : i32
    return %c0_i32, %c0_i32_0 : i32, i32
  }
  func.func @transform_6(%arg0: i32) -> (i32, i32) {
    %c0_i32 = arith.constant 0 : i32
    %c0_i32_0 = arith.constant 0 : i32
    %c0_i32_1 = arith.constant 0 : i32
    return %c0_i32, %c0_i32_0 : i32, i32
  }
  func.func @transform_7(%arg0: i32) -> (i32, i32) {
    %c0_i32 = arith.constant 0 : i32
    %c0_i32_0 = arith.constant 0 : i32
    %c0_i32_1 = arith.constant 0 : i32
    return %c0_i32, %c0_i32_0 : i32, i32
  }
  func.func @transform_8(%arg0: i32) -> (i32, i32) {
    %c0_i32 = arith.constant 0 : i32
    %c0_i32_0 = arith.constant 0 : i32
    %c0_i32_1 = arith.constant 0 : i32
    return %c0_i32, %c0_i32_0 : i32, i32
  }
  func.func @transform_9(%arg0: i32) -> (i32, i32, i32) {
    %c0_i32 = arith.constant 0 : i32
    %c0_i32_0 = arith.constant 0 : i32
    %c0_i32_1 = arith.constant 0 : i32
    %c0_i32_2 = arith.constant 0 : i32
    return %c0_i32, %c0_i32_0, %c0_i32_1 : i32, i32, i32
  }
  func.func @transform_10(%arg0: i32) -> (i32, i32, i32) {
    %c0_i32 = arith.constant 0 : i32
    %c0_i32_0 = arith.constant 0 : i32
    %c0_i32_1 = arith.constant 0 : i32
    return %arg0, %c0_i32, %c0_i32_0 : i32, i32, i32
  }
}

</mosaic_0001>

<bundles_post_ra>
// kernel: tpu_custom_call.1
= control target key start
LH: loop header
LB: loop body
LE: loop exit
PB: predicated region body
PF: predicated region fallthrough
CT: control target
= control target key end

     0   :  { %15 = vsyncpa [#allocation3], 0  ;;  %s1914_s0 = inlined_call_operand.vmem [shape: f32[2,16,256], index: 0, kind: input, shape index: {}]   ;;  %s1915_s1 = inlined_call_operand.vmem [shape: f32[9,16,1], index: 1, kind: input, shape index: {}]   ;;  %s1916_s2 = inlined_call_operand.vmem [shape: bf16[16,16], index: 2, kind: input, shape index: {}]   ;;  %s1917_s3 = inlined_call_operand.vmem [shape: bf16[16,16], index: 3, kind: input, shape index: {}]   ;;  %s1918_s4 = inlined_call_operand.vmem [shape: bf16[16,16], index: 4, kind: input, shape index: {}]   ;;  %s1919_s5 = inlined_call_operand.vmem [shape: bf16[16,16], index: 5, kind: input, shape index: {}]   ;;  %s1920_s6 = inlined_call_operand.vmem [shape: f32[16,1], index: 6, kind: input, shape index: {}]   ;;  %s1921_s7 = inlined_call_operand.vmem [shape: f32[16,1], index: 7, kind: input, shape index: {}]   ;;  %s1922_s8 = inlined_call_operand.vmem [shape: f32[16,16], index: 8, kind: input, shape index: {}]   ;;  %s1923_s9 = inlined_call_operand.vmem [shape: f32[9,1,256], index: 9, kind: input, shape index: {}]   ;;  %s1924_s10 = inlined_call_operand.hbm [shape: f32[2,16,256], index: 10, kind: output, shape index: {}]  }
   0x1   :  { %17 = vsyncpa [#allocation3 + $0x1], 0  ;;  %s1525_s13 = smov 0   ;;  %s1527_s14 = smov 0  }
   0x2   :  { %s1529_s15 = smov 0   ;;  %s1531_s16 = smov 0  }
   0x3 LB: > { %s1546_s17 = sadd.s32 4294967295, %s1455_s16   ;;  %s1266_s18 = sadd.s32 4294967294, %s1455_s16   ;;  %s1455_s16 = sphi %s1531_s16, %s1932_s16   ;;  %s1451_s15 = sphi %s1529_s15, %s1931_s15   ;;  %s1447_s14 = sphi %s1527_s14, %s1930_s14   ;;  %s1443_s13 = sphi %s1525_s13, %s1929_s13  }
   0x4   : > { %s1550_s19 = sadd.s32 1, %s1455_s16   ;;  %s245_s20 = sadd.s32 1, %s1451_s15 }
   0x5   : > { %s242_s21 = ssub.s32 %s1455_s16, %s1550_s19  ;;  %p255_p0 = scmp.ne.s32.totalorder %s1451_s15, %s1447_s14 }
   0x6   : > { %p243_p1 = scmp.eq.s32.totalorder %s242_s21, 0  ;;  %p256_p2 = scmp.eq.s32.totalorder %s1546_s17, 1 }
   0x7   : > { %p261_p3 = scmp.ne.s32.totalorder %s1447_s14, %s1443_s13  ;;  %p262_p4 = scmp.eq.s32.totalorder %s1266_s18, 1 }
   0x8   : > { %s1561_s22 = scalar_select %p243_p1, %s1451_s15, %s245_s20  }
   0x9   : > { %p1563_p5 = por %p256_p2, %p255_p0  ;;  %p1567_p6 = por %p262_p4, %p261_p3 }
   0xa   : > { %p1269_p7 = scmp.ge.s32.totalorder %s1455_s16, 1  ;;  %p315_p8 = scmp.lt.s32.totalorder %s1455_s16, 3 }
   0xc   : > { %p316_p9 = pnand %p1269_p7, %p315_p8 }
   0xd   : > { %v413_v0 = vld [vmem:[%s1915_s1] sm:$0xff] (!%p316_p9)  ;;  %p353_p10 = scmp.lt.s32.totalorder (!%p316_p9), %s1546_s17, 1  ;;  %v1457_v2 = vmov (!%p316_p9), 0   ;;  %v1274_v4 = vld [vmem:[%s1915_s1 + $0x48] sm:$0xff] (!%p316_p9)  ;;  %v1277_v7 = vld [vmem:[%s1915_s1 + $0x18] sm:$0xff] (!%p316_p9)  ;;  %s1925_s25 = smov (!%p316_p9), 16   ;;  %v390_v27 = vlaneseq (!%p316_p9) }
   0xe   : > { %319 = sbr.rel (%p316_p9) target bundleno = 1625 (0x659), region = 60  ;;  %v1273_v1 = vld [vmem:[%s1915_s1 + $0x40] sm:$0xff] (!%p316_p9)  ;;  %1372 = vset.pattern.permute.xlu1 (!%p316_p9), %v1457_v2  ;;  %1371 = vset.pattern.permute.xlu0 (!%p316_p9), %v1457_v2  ;;  %v414_v5 = vld [vmem:[%s1915_s1 + $0x8] sm:$0xff] (!%p316_p9)  ;;  %v367_v6 = vadd.f32 (!%p316_p9), 1.0, %v1274_v4  ;;  %v1276_v8 = vld [vmem:[%s1915_s1 + $0x10] sm:$0xff] (!%p316_p9)  ;;  %s1461_s21 = smov (!%p316_p9), 1  }
   0xf   : > { %v366_v3 = vadd.f32 (!%p316_p9), 1.0, %v1273_v1  ;;  %417 = vperm.xlu1 (!%p316_p9), %1372, %v413_v0   ;;  %835 = vmatprep.mubr.bf16.mxu0 (!%p316_p9), %v1457_v2  ;;  %v1280_v13 = vld [vmem:[%s1915_s1 + $0x28] sm:$0xff] (!%p316_p9)  ;;  %v1279_v14 = vld [vmem:[%s1915_s1 + $0x20] sm:$0xff] (!%p316_p9)  ;;  %v1283_v15 = vld [vmem:[%s1915_s1 + $0x38] sm:$0xff] (!%p316_p9)  ;;  %v400_v30 = vshrl.u32 (!%p316_p9), %v390_v27, 7  ;;  %v1680_v33 = vand.u32 (!%p316_p9), 127, %v390_v27 }
  0x10   : > { %888 = vmatprep.mubr.bf16.mxu1 (!%p316_p9), %v1457_v2  ;;  %v1282_v16 = vld [vmem:[%s1915_s1 + $0x30] sm:$0xff] (!%p316_p9)  ;;  %v1286_v17 = vld [vmem:[%s1915_s1 + $0x58] sm:$0xff] (!%p316_p9)  ;;  %v1289_v19 = vld [vmem:[%s1915_s1 + $0x68] sm:$0xff] (!%p316_p9)  ;;  %vm799_vm8 = vcmask (!%p316_p9), 130048   ;;  %vm1467_vm9 = vmmov (!%p316_p9), 0   ;;  %s350_s28 = sand.u32 (!%p316_p9), 1, %s1447_s14  }
  0x11   : > { %370 = vperm.xlu0 (!%p316_p9), %1371, %v366_v3   ;;  %v1285_v18 = vld [vmem:[%s1915_s1 + $0x50] sm:$0xff] (!%p316_p9)  ;;  %v1288_v20 = vld [vmem:[%s1915_s1 + $0x60] sm:$0xff] (!%p316_p9)  ;;  %v1292_v21 = vld [vmem:[%s1915_s1 + $0x78] sm:$0xff] (!%p316_p9)  ;;  %v1682_v34 = vsub.s32 (!%p316_p9), 0, %v400_v30  ;;  %v1684_v35 = vsub.s32 (!%p316_p9), 1, %v400_v30  ;;  %vm392_vm0 = vcmp.lt.s32.totalorder (!%p316_p9), %v1680_v33, 17 }
  0x12   : > { %v1291_v22 = vld [vmem:[%s1915_s1 + $0x70] sm:$0xff] (!%p316_p9)  ;;  %v1295_v23 = vld [vmem:[%s1915_s1 + $0x88] sm:$0xff] (!%p316_p9)  ;;  %v1294_v24 = vld [vmem:[%s1915_s1 + $0x80] sm:$0xff] (!%p316_p9)  ;;  %vm441_vm1 = vcmp.lt.s32.totalorder (!%p316_p9), %v1680_v33, 16  ;;  %vm492_vm2 = vcmp.lt.s32.totalorder (!%p316_p9), %v1680_v33, 15  ;;  %vm543_vm3 = vcmp.lt.s32.totalorder (!%p316_p9), %v1680_v33, 1 }
  0x13   : > { %422 = vperm.xlu1 (!%p316_p9), %1372, %v414_v5   ;;  %v397_v36 = vld [vmem:[%s1923_s9] sm:$0x3] (!%p316_p9)  ;;  %v1275_v1 = vld [vmem:[%s1923_s9 + $0x2] sm:$0x3] (!%p316_p9)  ;;  %v1278_v27 = vld [vmem:[%s1923_s9 + $0x4] sm:$0x3] (!%p316_p9) }
  0x14   : > { %v402_v39 = vrot.slane (!%p316_p9), %v397_v36, %v1682_v34  ;;  %v406_v40 = vrot.slane (!%p316_p9), %v397_v36, %v1684_v35  ;;  %v452_v5 = vrot.slane (!%p316_p9), %v1275_v1, %v1682_v34  ;;  %v503_v30 = vrot.slane (!%p316_p9), %v1278_v27, %v1682_v34  ;;  %s1270_s29 = sshll.u32 (!%p316_p9), %s350_s28, 5  ;;  %s1311_s12 = sshll.u32 (!%p316_p9), %s1546_s17, 9 }
  0x15   : > { %s354_s11 = scalar_select %p353_p10, %s1546_s17, 1  ;;  %375 = vperm.xlu0 %1371, %v367_v6   ;;  %v456_v6 = vrot.slane %v1275_v1, %v1684_v35  ;;  %vm594_vm4 = vcmp.lt.s32.totalorder %v1680_v33, 127  ;;  %vm645_vm5 = vcmp.lt.s32.totalorder %v1680_v33, 113  ;;  %vm696_vm6 = vcmp.lt.s32.totalorder %v1680_v33, 112 }
  0x16   : > { %vm747_vm7 = vcmp.lt.s32.totalorder %v1680_v33, 111  ;;  %s1872_s17 = scalar_lea.sflag [#allocation3], %s350_s28  ;;  %s1468_s27 = smov [#allocation2]  }
  0x17   : > { %s1310_s20 = sshll.u32 %s354_s11, 5  ;;  %473 = vperm.xlu1 %1372, %v1277_v7   ;;  %s1458_s11 = smov 17  }
  0x18   : > { %s357_s30 = scalar_lea.vmem %s1914_s0, %s1310_s20 }
  0x19   : > { %468 = vperm.xlu0 %1371, %v1276_v8   ;;  %v1600_v9 = vld [vmem:[%s357_s30 + $0x10] sm:$0xff]  ;;  %v1602_v10 = vld [vmem:[%s357_s30] sm:$0xff]  ;;  %v1606_v11 = vld [vmem:[%s357_s30 + $0x18] sm:$0xff] }
  0x1a   : > { %v1608_v12 = vld [vmem:[%s357_s30 + $0x8] sm:$0xff]  ;;  %s1460_s30 = smov 15  }
  0x1b   : > { %384 = vrot.lane.b32.xlu1 %v1600_v9, %s1458_s11 }
  0x1d   : > { %382 = vrot.lane.b32.xlu0 %v1602_v10, %s1458_s11 }
  0x1f   : > { %388 = vrot.lane.b32.xlu1 %v1606_v11, %s1458_s11 }
  0x21   : > { %386 = vrot.lane.b32.xlu0 %v1608_v12, %s1458_s11  ;;  %s1465_s11 = smov 111  }
  0x23   : > { %524 = vperm.xlu1 %1372, %v1280_v13  }
  0x25   : > { %519 = vperm.xlu0 %1371, %v1279_v14  }
  0x27   : > { %435 = vrot.lane.b32.xlu1 %v1600_v9, %s1925_s25 }
  0x29   : > { %433 = vrot.lane.b32.xlu0 %v1602_v10, %s1925_s25 }
  0x2b   : > { %439 = vrot.lane.b32.xlu1 %v1606_v11, %s1925_s25 }
  0x2d   : > { %437 = vrot.lane.b32.xlu0 %v1608_v12, %s1925_s25 }
  0x2f   : > { %575 = vperm.xlu1 %1372, %v1283_v15  }
  0x31   : > { %570 = vperm.xlu0 %1371, %v1282_v16  }
  0x33   : > { %486 = vrot.lane.b32.xlu1 %v1600_v9, %s1460_s30 }
  0x35   : > { %484 = vrot.lane.b32.xlu0 %v1602_v10, %s1460_s30 }
  0x37   : > { %490 = vrot.lane.b32.xlu1 %v1606_v11, %s1460_s30 }
  0x39   : > { %488 = vrot.lane.b32.xlu0 %v1608_v12, %s1460_s30  ;;  %s1462_s30 = smov 127  }
  0x3b   : > { %626 = vperm.xlu1 %1372, %v1286_v17  }
  0x3d   : > { %621 = vperm.xlu0 %1371, %v1285_v18  }
  0x3f   : > { %537 = vrot.lane.b32.xlu1 %v1600_v9, %s1461_s21 }
  0x41   : > { %535 = vrot.lane.b32.xlu0 %v1602_v10, %s1461_s21 }
  0x43   : > { %541 = vrot.lane.b32.xlu1 %v1606_v11, %s1461_s21 }
  0x45   : > { %539 = vrot.lane.b32.xlu0 %v1608_v12, %s1461_s21  ;;  %s1463_s21 = smov 113  }
  0x47   : > { %677 = vperm.xlu1 %1372, %v1289_v19  }
  0x49   : > { %672 = vperm.xlu0 %1371, %v1288_v20  }
  0x4b   : > { %588 = vrot.lane.b32.xlu1 %v1600_v9, %s1462_s30 }
  0x4d   : > { %586 = vrot.lane.b32.xlu0 %v1602_v10, %s1462_s30 }
  0x4f   : > { %592 = vrot.lane.b32.xlu1 %v1606_v11, %s1462_s30 }
  0x51   : > { %590 = vrot.lane.b32.xlu0 %v1608_v12, %s1462_s30  ;;  %s1464_s30 = smov 112  }
  0x53   : > { %728 = vperm.xlu1 %1372, %v1292_v21  }
  0x55   : > { %723 = vperm.xlu0 %1371, %v1291_v22  }
  0x57   : > { %639 = vrot.lane.b32.xlu1 %v1600_v9, %s1463_s21 }
  0x59   : > { %637 = vrot.lane.b32.xlu0 %v1602_v10, %s1463_s21 }
  0x5b   : > { %643 = vrot.lane.b32.xlu1 %v1606_v11, %s1463_s21 }
  0x5d   : > { %641 = vrot.lane.b32.xlu0 %v1608_v12, %s1463_s21  ;;  %s1870_s21 = scalar_lea.hbm %s1924_s10, %s1311_s12 }
  0x5f   : > { %779 = vperm.xlu1 %1372, %v1295_v23  }
  0x61   : > { %774 = vperm.xlu0 %1371, %v1294_v24  }
  0x63   : > { %690 = vrot.lane.b32.xlu1 %v1600_v9, %s1464_s30 }
  0x65   : > { %688 = vrot.lane.b32.xlu0 %v1602_v10, %s1464_s30 }
  0x67   : > { %694 = vrot.lane.b32.xlu1 %v1606_v11, %s1464_s30 }
  0x69   : > { %692 = vrot.lane.b32.xlu0 %v1608_v12, %s1464_s30  ;;  %s352_s30 = scalar_lea.vmem [#allocation2], %s1270_s29  ;;  %s1397_s29 = sshll.u32 %s1468_s27, 4  ;;  %s1398_s29 = int_to_ptr.vmem [resolvable:$false] %s1397_s29 }
  0x6a   : > { %s1399_s25 = scalar_lea.vmem %s1398_s29, 1024 }
  0x6b   : > { %741 = vrot.lane.b32.xlu1 %v1600_v9, %s1465_s11 }
  0x6d   : > { %739 = vrot.lane.b32.xlu0 %v1602_v10, %s1465_s11 }
  0x6f   : > { %745 = vrot.lane.b32.xlu1 %v1606_v11, %s1465_s11 }
  0x71   : > { %743 = vrot.lane.b32.xlu0 %v1608_v12, %s1465_s11  ;;  %s1204_s11 = sshll.u32 %s352_s30, 4  ;;  %s1865_s11 = int_to_ptr.vmem [resolvable:$true] %s1204_s11 }
  0x72   : > { %s1393_s26 = scalar_lea.vmem %s1865_s11, 512  ;;  %p1400_p0 = scmp.lt.s32.totalorder %s1865_s11, %s1398_s29 }
  0x73   : > { %p1394_p11 = scmp.ne.s32.totalorder %s1865_s11, %s1393_s26  ;;  %p1401_p1 = scmp.lt.s32.totalorder %s1399_s25, %s1393_s26 }
  0x75   : > { %p1395_p12 = pnand %p1394_p11, %p1563_p5  ;;  %p1402_p2 = por %p1401_p1, %p1400_p0 }
  0x77   : > { %p1396_p13 = pneg %p1395_p12 }
  0x79   : > { %p1403_p3 = pnand %p1402_p2, %p1396_p13 }
  0x8e   : > { %v418_v25 = vpop.permute.xlu1 %417 }
  0x90   : > { %v371_v26 = vpop.permute.xlu0 %370 }
  0x91   : > { %v378_v56 = vmul.f32 %v371_v26, %v1602_v10  ;;  %v379_v57 = vmul.f32 %v371_v26, %v1608_v12 }
  0x92   : > { %v423_v28 = vpop.permute.xlu1 %422 }
  0x94   : > { %v376_v29 = vpop.permute.xlu0 %375 }
  0x95   : > { %v380_v51 = vmul.f32 %v376_v29, %v1600_v9  ;;  %v381_v52 = vmul.f32 %v376_v29, %v1606_v11 }
  0x96   : > { %v474_v31 = vpop.permute.xlu1 %473 }
  0x98   : > { %v469_v32 = vpop.permute.xlu0 %468 }
  0x9a   : > { %v385_v37 = vpop.permute.xlu1 %384 }
  0x9c   : > { %v383_v38 = vpop.permute.xlu0 %382 }
  0x9e   : > { %v389_v41 = vpop.permute.xlu1 %388 }
  0x9f   : > { %v394_v42 = vsel %vm392_vm0, %v385_v37, %v389_v41  ;;  %v396_v43 = vsel %vm392_vm0, %v389_v41, %v385_v37 }
  0xa0   : > { %v387_v44 = vpop.permute.xlu0 %386  ;;  %v411_v45 = vmul.f32 %v402_v39, %v396_v43  ;;  %v412_v46 = vmul.f32 %v406_v40, %v394_v42 }
  0xa1   : > { %v393_v47 = vsel %vm392_vm0, %v383_v38, %v387_v44  ;;  %v395_v48 = vsel %vm392_vm0, %v387_v44, %v383_v38 }
  0xa2   : > { %v409_v49 = vmul.f32 %v402_v39, %v395_v48  ;;  %v410_v50 = vmul.f32 %v406_v40, %v393_v47  ;;  %v427_v53 = vmul.f32 %v423_v28, %v411_v45  ;;  %v428_v54 = vmul.f32 %v423_v28, %v412_v46  ;;  %v525_v55 = vpop.permute.xlu1 %524 }
  0xa4   : > { %v425_v58 = vmul.f32 %v418_v25, %v409_v49  ;;  %v426_v59 = vmul.f32 %v418_v25, %v410_v50  ;;  %v520_v60 = vpop.permute.xlu0 %519  ;;  %v431_v61 = vadd.f32 %v427_v53, %v380_v51  ;;  %v432_v62 = vadd.f32 %v428_v54, %v381_v52 }
  0xa6   : > { %v429_v63 = vadd.f32 %v425_v58, %v378_v56  ;;  %v430_v0 = vadd.f32 %v426_v59, %v379_v57  ;;  %v436_v3 = vpop.permute.xlu1 %435 }
  0xa8   : > { %v434_v4 = vpop.permute.xlu0 %433 }
  0xaa   : > { %v440_v7 = vpop.permute.xlu1 %439 }
  0xab   : > { %v443_v8 = vsel %vm441_vm1, %v436_v3, %v440_v7  ;;  %v445_v9 = vsel %vm441_vm1, %v440_v7, %v436_v3 }
  0xac   : > { %v438_v10 = vpop.permute.xlu0 %437  ;;  %v461_v11 = vmul.f32 %v452_v5, %v445_v9  ;;  %v462_v12 = vmul.f32 %v456_v6, %v443_v8 }
  0xad   : > { %v442_v13 = vsel %vm441_vm1, %v434_v4, %v438_v10  ;;  %v444_v14 = vsel %vm441_vm1, %v438_v10, %v434_v4 }
  0xae   : > { %v459_v15 = vmul.f32 %v452_v5, %v444_v14  ;;  %v460_v16 = vmul.f32 %v456_v6, %v442_v13  ;;  %v478_v17 = vmul.f32 %v474_v31, %v461_v11  ;;  %v479_v18 = vmul.f32 %v474_v31, %v462_v12  ;;  %v1702_v19 = vpop.permute.xlu1 %575  ;;  %v1281_v6 = vld [vmem:[%s1923_s9 + $0x6] sm:$0x3]  ;;  %v1284_v13 = vld [vmem:[%s1923_s9 + $0xa] sm:$0x3]  ;;  %v1287_v14 = vld [vmem:[%s1923_s9 + $0xc] sm:$0x3] }
  0xaf   : > { %v507_v31 = vrot.slane %v1278_v27, %v1684_v35  ;;  %v554_v8 = vrot.slane %v1281_v6, %v1682_v34  ;;  %v558_v9 = vrot.slane %v1281_v6, %v1684_v35  ;;  %v660_v27 = vrot.slane %v1287_v14, %v1684_v35 }
  0xb0   : > { %v476_v20 = vmul.f32 %v469_v32, %v459_v15  ;;  %v477_v21 = vmul.f32 %v469_v32, %v460_v16  ;;  %v1704_v22 = vpop.permute.xlu0 %570  ;;  %v482_v23 = vadd.f32 %v478_v17, %v431_v61  ;;  %v483_v24 = vadd.f32 %v479_v18, %v432_v62 }
  0xb2   : > { %v480_v25 = vadd.f32 %v476_v20, %v429_v63  ;;  %v481_v26 = vadd.f32 %v477_v21, %v430_v0  ;;  %v487_v28 = vpop.permute.xlu1 %486  ;;  %v605_v21 = vrot.slane %v1284_v13, %v1682_v34 }
  0xb4   : > { %v485_v29 = vpop.permute.xlu0 %484 }
  0xb6   : > { %v491_v36 = vpop.permute.xlu1 %490 }
  0xb7   : > { %v494_v32 = vsel %vm492_vm2, %v487_v28, %v491_v36  ;;  %v496_v37 = vsel %vm492_vm2, %v491_v36, %v487_v28 }
  0xb8   : > { %v489_v38 = vpop.permute.xlu0 %488  ;;  %v512_v39 = vmul.f32 %v503_v30, %v496_v37  ;;  %v513_v40 = vmul.f32 %v507_v31, %v494_v32 }
  0xb9   : > { %v493_v41 = vsel %vm492_vm2, %v485_v29, %v489_v38  ;;  %v495_v42 = vsel %vm492_vm2, %v489_v38, %v485_v29 }
  0xba   : > { %v510_v43 = vmul.f32 %v503_v30, %v495_v42  ;;  %v511_v44 = vmul.f32 %v507_v31, %v493_v41  ;;  %v529_v45 = vmul.f32 %v525_v55, %v512_v39  ;;  %v530_v46 = vmul.f32 %v525_v55, %v513_v40  ;;  %v1712_v47 = vpop.permute.xlu1 %626 }
  0xbc   : > { %v527_v48 = vmul.f32 %v520_v60, %v510_v43  ;;  %v528_v49 = vmul.f32 %v520_v60, %v511_v44  ;;  %v1714_v50 = vpop.permute.xlu0 %621  ;;  %v1716_v51 = vadd.f32 %v529_v45, %v482_v23  ;;  %v1718_v52 = vadd.f32 %v530_v46, %v483_v24  ;;  %v1290_v24 = vld [vmem:[%s1923_s9 + $0xe] sm:$0x3] }
  0xbd   : > { %v707_v38 = vrot.slane %v1290_v24, %v1682_v34  ;;  %v711_v46 = vrot.slane %v1290_v24, %v1684_v35 }
  0xbe   : > { %v1720_v53 = vadd.f32 %v527_v48, %v480_v25  ;;  %v1722_v54 = vadd.f32 %v528_v49, %v481_v26  ;;  %v538_v56 = vpop.permute.xlu1 %537  ;;  %v609_v25 = vrot.slane %v1284_v13, %v1684_v35  ;;  %v656_v26 = vrot.slane %v1287_v14, %v1682_v34 }
  0xc0   : > { %v536_v57 = vpop.permute.xlu0 %535 }
  0xc2   : > { %v542_v58 = vpop.permute.xlu1 %541 }
  0xc3   : > { %v545_v11 = vsel %vm543_vm3, %v538_v56, %v542_v58  ;;  %v547_v12 = vsel %vm543_vm3, %v542_v58, %v538_v56 }
  0xc4   : > { %v540_v59 = vpop.permute.xlu0 %539  ;;  %v563_v18 = vmul.f32 %v554_v8, %v547_v12  ;;  %v564_v20 = vmul.f32 %v558_v9, %v545_v11  ;;  %v1293_v12 = vld [vmem:[%s1923_s9 + $0x10] sm:$0x3] }
  0xc5   : > { %v544_v15 = vsel %vm543_vm3, %v536_v57, %v540_v59  ;;  %v546_v16 = vsel %vm543_vm3, %v540_v59, %v536_v57 }
  0xc6   : > { %v1724_v61 = vpop.permute.xlu1 %677  ;;  %v561_v28 = vmul.f32 %v554_v8, %v546_v16  ;;  %v562_v29 = vmul.f32 %v558_v9, %v544_v15  ;;  %v580_v39 = vmul.f32 %v1702_v19, %v563_v18  ;;  %v581_v40 = vmul.f32 %v1702_v19, %v564_v20 }
  0xc8   : > { %v1726_v55 = vpop.permute.xlu0 %672  ;;  %v578_v48 = vmul.f32 %v1704_v22, %v561_v28  ;;  %v579_v49 = vmul.f32 %v1704_v22, %v562_v29  ;;  %v762_v28 = vrot.slane %v1293_v12, %v1684_v35 }
  0xca   : > { %v589_v62 = vpop.permute.xlu1 %588  ;;  %v582_v18 = vadd.f32 %v578_v48, %v1720_v53  ;;  %v583_v20 = vadd.f32 %v579_v49, %v1722_v54 }
  0xcc   : > { %v587_v60 = vpop.permute.xlu0 %586 }
  0xce   : > { %v593_v63 = vpop.permute.xlu1 %592 }
  0xcf   : > { %v596_v30 = vsel %vm594_vm4, %v589_v62, %v593_v63  ;;  %v598_v31 = vsel %vm594_vm4, %v593_v63, %v589_v62  ;;  %v584_v63 = vadd.f32 %v580_v39, %v1716_v51 }
  0xd0   : > { %v591_v0 = vpop.permute.xlu0 %590  ;;  %v614_v44 = vmul.f32 %v605_v21, %v596_v30  ;;  %v615_v45 = vmul.f32 %v609_v25, %v598_v31 }
  0xd1   : > { %v595_v36 = vsel %vm594_vm4, %v587_v60, %v591_v0  ;;  %v597_v32 = vsel %vm594_vm4, %v591_v0, %v587_v60  ;;  %v585_v0 = vadd.f32 %v581_v40, %v1718_v52 }
  0xd2   : > { %v1728_v1 = vpop.permute.xlu1 %728  ;;  %v612_v56 = vmul.f32 %v605_v21, %v595_v36  ;;  %v613_v57 = vmul.f32 %v609_v25, %v597_v32  ;;  %v632_v8 = vmul.f32 %v1712_v47, %v615_v45 }
  0xd4   : > { %v1730_v3 = vpop.permute.xlu0 %723  ;;  %v629_v51 = vmul.f32 %v1714_v50, %v612_v56  ;;  %v630_v52 = vmul.f32 %v1714_v50, %v613_v57 }
  0xd6   : > { %v640_v4 = vpop.permute.xlu1 %639  ;;  %v633_v29 = vadd.f32 %v629_v51, %v582_v18  ;;  %v634_v30 = vadd.f32 %v630_v52, %v583_v20 }
  0xd8   : > { %v638_v5 = vpop.permute.xlu0 %637 }
  0xda   : > { %v644_v7 = vpop.permute.xlu1 %643 }
  0xdb   : > { %v647_v41 = vsel %vm645_vm5, %v640_v4, %v644_v7  ;;  %v649_v42 = vsel %vm645_vm5, %v644_v7, %v640_v4  ;;  %v631_v7 = vmul.f32 %v1712_v47, %v614_v44 }
  0xdc   : > { %v642_v10 = vpop.permute.xlu0 %641  ;;  %v665_v19 = vmul.f32 %v656_v26, %v647_v41  ;;  %v666_v58 = vmul.f32 %v660_v27, %v649_v42 }
  0xdd   : > { %v646_v59 = vsel %vm645_vm5, %v638_v5, %v642_v10  ;;  %v648_v62 = vsel %vm645_vm5, %v642_v10, %v638_v5  ;;  %v635_v25 = vadd.f32 %v631_v7, %v584_v63 }
  0xde   : > { %v1745_v17 = vpop.permute.xlu1 %779  ;;  %v663_v10 = vmul.f32 %v656_v26, %v646_v59  ;;  %v664_v11 = vmul.f32 %v660_v27, %v648_v62  ;;  %v682_v13 = vmul.f32 %v1724_v61, %v665_v19  ;;  %v683_v47 = vmul.f32 %v1724_v61, %v666_v58 }
  0xdf   : > { %v636_v26 = vadd.f32 %v632_v8, %v585_v0  ;;  %v758_v27 = vrot.slane %v1293_v12, %v1682_v34 }
  0xe0   : > { %v1748_v23 = vpop.permute.xlu0 %774  ;;  %v680_v61 = vmul.f32 %v1726_v55, %v663_v10  ;;  %v681_v31 = vmul.f32 %v1726_v55, %v664_v11  ;;  %v686_v36 = vadd.f32 %v682_v13, %v635_v25  ;;  %v1034_v25 = vld [vmem:[%s1921_s7 + $0x8] sm:$0xff] }
  0xe1   : > { %v687_v32 = vadd.f32 %v683_v47, %v636_v26 }
  0xe2   : > { %v691_v37 = vpop.permute.xlu1 %690  ;;  %v685_v44 = vadd.f32 %v681_v31, %v634_v30 }
  0xe4   : > { %v689_v43 = vpop.permute.xlu0 %688 }
  0xe6   : > { %v695_v60 = vpop.permute.xlu1 %694 }
  0xe7   : > { %v698_v4 = vsel %vm696_vm6, %v691_v37, %v695_v60  ;;  %v700_v22 = vsel %vm696_vm6, %v695_v60, %v691_v37 }
  0xe8   : > { %v693_v6 = vpop.permute.xlu0 %692  ;;  %v716_v14 = vmul.f32 %v707_v38, %v698_v4  ;;  %v717_v15 = vmul.f32 %v711_v46, %v700_v22  ;;  %v1373_v22 = vld [vmem:[%s1916_s2] sm:$0xff]  }
  0xe9   : > { %v697_v9 = vsel %vm696_vm6, %v689_v43, %v693_v6  ;;  %v699_v5 = vsel %vm696_vm6, %v693_v6, %v689_v43  ;;  %v684_v43 = vadd.f32 %v680_v61, %v633_v29 }
  0xea   : > { %v742_v16 = vpop.permute.xlu1 %741  ;;  %v714_v21 = vmul.f32 %v707_v38, %v697_v9  ;;  %v715_v24 = vmul.f32 %v711_v46, %v699_v5  ;;  %v733_v53 = vmul.f32 %v1728_v1, %v716_v14  ;;  %v734_v54 = vmul.f32 %v1728_v1, %v717_v15 }
  0xec   : > { %v740_v50 = vpop.permute.xlu0 %739  ;;  %v731_v38 = vmul.f32 %v1730_v3, %v714_v21  ;;  %v732_v39 = vmul.f32 %v1730_v3, %v715_v24  ;;  %v737_v3 = vadd.f32 %v733_v53, %v686_v36  ;;  %v738_v48 = vadd.f32 %v734_v54, %v687_v32 }
  0xee   : > { %v746_v37 = vpop.permute.xlu1 %745  ;;  %v735_v57 = vadd.f32 %v731_v38, %v684_v43  ;;  %v736_v19 = vadd.f32 %v732_v39, %v685_v44 }
  0xef   : > { %v749_v34 = vsel %vm747_vm7, %v742_v16, %v746_v37  ;;  %v751_v35 = vsel %vm747_vm7, %v746_v37, %v742_v16 }
  0xf0   : > { %v744_v40 = vpop.permute.xlu0 %743  ;;  %v767_v41 = vmul.f32 %v758_v27, %v749_v34  ;;  %v768_v55 = vmul.f32 %v762_v28, %v751_v35 }
  0xf1   : > { %v748_v42 = vsel %vm747_vm7, %v740_v50, %v744_v40  ;;  %v750_v1 = vsel %vm747_vm7, %v744_v40, %v740_v50  ;;  %v1033_v50 = vld [vmem:[%s1921_s7] sm:$0xff] }
  0xf2   : > { %v765_v45 = vmul.f32 %v758_v27, %v748_v42  ;;  %v766_v46 = vmul.f32 %v762_v28, %v750_v1  ;;  %v784_v49 = vmul.f32 %v1745_v17, %v767_v41  ;;  %v785_v56 = vmul.f32 %v1745_v17, %v768_v55  ;;  %v1374_v17 = vld [vmem:[%s1917_s3] sm:$0xff]  }
  0xf4   : > { %v782_v58 = vmul.f32 %v1748_v23, %v765_v45  ;;  %v783_v59 = vmul.f32 %v1748_v23, %v766_v46  ;;  %v789_v62 = vadd.f32 %v785_v56, %v738_v48  ;;  %v788_v60 = vadd.f32 %v784_v49, %v737_v3  ;;  %v1047_v48 = vld [vmem:[%s1922_s8] sm:$0xff] }
  0xf6   : > { %v787_v33 = vadd.f32 %v783_v59, %v736_v19  ;;  %v786_v63 = vadd.f32 %v782_v58, %v735_v57  ;;  %v1048_v58 = vld [vmem:[%s1922_s8 + $0x8] sm:$0xff] }
  0xf8   : > { %v791_v0 = vpack.c.bf16 %v789_v62, %v787_v33  ;;  %v790_v4 = vpack.c.bf16 %v788_v60, %v786_v63 }
  0xfa   : > { %803 = vmatprep.subr.bf16.mxu0 %v791_v0  ;;  %856 = vmatprep.subr.bf16.mxu1 %v791_v0 }
  0xfb   : > { %804 = vmatpush1.bf16.msra.mxu0 %v790_v4  ;;  %857 = vmatpush1.bf16.msra.mxu1 %v790_v4 }
  0xfc   : > { %909 = vmatprep.subr.bf16.mxu0 %v791_v0 }
  0xfe   : > { %1297 = vmatmul.mubr.msk.bf16.vlgmr.msra.gmra.mrb[0].mxu0 %vm799_vm8, %v1373_v22  ;;  %1299 = vmatmul.mubr.msk.bf16.vlgmr.msra.gmra.mrb[0].mxu1 %vm799_vm8, %v1374_v17 }
  0xff   : > { %910 = vmatpush1.bf16.msra.mxu0 %v790_v4  ;;  %941 = vmatprep.mubr.bf16.mxu0 %v1457_v2 }
 0x1d1   : > { %v837_v23 = vpop.f32.mrb[0].mxu0  ;;  %v890_v6 = vpop.f32.mrb[0].mxu1 }
 0x1d2   : > { %v952_v7 = vmul.f32 %v837_v23, %v837_v23  ;;  %v839_v8 = vpop.f32.mrb[1].mxu0  ;;  %v972_v9 = vmul.f32 %v890_v6, %v890_v6  ;;  %v892_v5 = vpop.f32.mrb[1].mxu1 }
 0x1d3   : > { %v953_v51 = vmul.f32 %v839_v8, %v839_v8  ;;  %v841_v52 = vpop.f32.mrb[2].mxu0  ;;  %v973_v10 = vmul.f32 %v892_v5, %v892_v5  ;;  %v894_v11 = vpop.f32.mrb[2].mxu1 }
 0x1d4   : > { %v954_v12 = vmul.f32 %v841_v52, %v841_v52  ;;  %v843_v13 = vpop.f32.mrb[3].mxu0  ;;  %v974_v47 = vmul.f32 %v894_v11, %v894_v11  ;;  %v896_v14 = vpop.f32.mrb[3].mxu1 }
 0x1d5   : > { %v955_v15 = vmul.f32 %v843_v13, %v843_v13  ;;  %v975_v16 = vmul.f32 %v896_v14, %v896_v14  ;;  %v956_v18 = vadd.f32 %v953_v51, %v952_v7  ;;  %v976_v20 = vadd.f32 %v973_v10, %v972_v9  ;;  %v1128_v51 = vld [vmem:[%s1920_s6] sm:$0xff]  ;;  %v1129_v10 = vld [vmem:[%s1920_s6 + $0x8] sm:$0xff] }
 0x1d7   : > { %957 = vadd.xlane.f32.xlu0 %v956_v18  ;;  %v959_v21 = vadd.f32 %v955_v15, %v954_v12  ;;  %v979_v24 = vadd.f32 %v975_v16, %v974_v47 }
 0x1d9   : > { %960 = vadd.xlane.f32.xlu1 %v959_v21 }
 0x1db   : > { %977 = vadd.xlane.f32.xlu0 %v976_v20  ;;  %v1376_v20 = vld [vmem:[%s1919_s5] sm:$0xff]  }
 0x1df   : > { %980 = vadd.xlane.f32.xlu0 %v979_v24 }
 0x1ea   : > { %1037 = vperm.xlu1 %1372, %v1033_v50  }
 0x1f5   : > { %1042 = vperm.xlu0 %1371, %v1034_v25  }
 0x264   : > { %v958_v26 = vpop.xlane.xlu0 %957 }
 0x265   : > { %v962_v27 = vmax.f32 %v958_v26, 1e-24 }
 0x266   : > { %v961_v28 = vpop.xlane.xlu1 %960 }
 0x267   : > { %1377 = vrsqrt.f32 %v962_v27  ;;  %v963_v29 = vmax.f32 %v961_v28, 1e-24 }
 0x268   : > { %v978_v30 = vpop.xlane.xlu0 %977 }
 0x269   : > { %1379 = vrsqrt.f32 %v963_v29  ;;  %v982_v61 = vmax.f32 %v978_v30, 1e-24 }
 0x26a   : > { %v1038_v46 = vpop.permute.xlu1 %1037 }
 0x26b   : > { %1381 = vrsqrt.f32 %v982_v61 }
 0x26c   : > { %v981_v31 = vpop.xlane.xlu0 %980 }
 0x26d   : > { %v983_v36 = vmax.f32 %v981_v31, 1e-24 }
 0x26f   : > { %1383 = vrsqrt.f32 %v983_v36 }
 0x271   : > { %v1378_v32 = vpop.eup %1377 }
 0x272   : > { %v967_v54 = vmul.f32 %v1378_v32, %v839_v8  ;;  %v966_v38 = vmul.f32 %v1378_v32, %v837_v23 }
 0x273   : > { %v1380_v53 = vpop.eup %1379 }
 0x274   : > { %v969_v37 = vmul.f32 %v1380_v53, %v843_v13  ;;  %v968_v39 = vmul.f32 %v1380_v53, %v841_v52  ;;  %v1043_v57 = vpop.permute.xlu0 %1042  ;;  %v1375_v52 = vld [vmem:[%s1918_s4] sm:$0xff]  }
 0x275   : > { %v1382_v40 = vpop.eup %1381  ;;  %1301 = vmatmul.mubr.msk.bf16.vlgmr.msra.gmra.mrb[4].mxu0 %vm799_vm8, %v1375_v52 }
 0x276   : > { %v971_v34 = vpack.c.bf16 %v969_v37, %v967_v54  ;;  %v970_v35 = vpack.c.bf16 %v968_v39, %v966_v38  ;;  %v987_v55 = vmul.f32 %v1382_v40, %v892_v5  ;;  %v986_v1 = vmul.f32 %v1382_v40, %v890_v6 }
 0x278   : > { %992 = vmatprep.subr.bf16.mxu1 %v971_v34 }
 0x279   : > { %v1384_v41 = vpop.eup %1383  ;;  %993 = vmatpush1.bf16.xpose.msra.mxu1 %v970_v35 }
 0x27a   : > { %v989_v42 = vmul.f32 %v1384_v41, %v896_v14  ;;  %v988_v43 = vmul.f32 %v1384_v41, %v894_v11  ;;  %v1466_v11 = vmov 0.0  }
 0x27b   : > { %1314 = vmatprep.subr.bf16.mxu0 %v1466_v11  ;;  %1316 = vmatprep.mubr.msk.bf16.mxu0 %vm1467_vm9, %v1466_v11 }
 0x27c   : > { %v991_v44 = vpack.c.bf16 %v989_v42, %v987_v55  ;;  %v990_v45 = vpack.c.bf16 %v988_v43, %v986_v1 }
 0x27e   : > { %1024 = vmatprep.mubr.bf16.mxu1 %v991_v44 }
 0x280   : > { %1025 = vmatmul.mubr.bf16.vlgmr.msra.gmra.mrb[4].mxu1 %v990_v45 }
 0x281   : > { %1175 = vmatprep.mubr.bf16.mxu1 %v1457_v2 }
 0x348   : > { %v943_v21 = vpop.f32.mrb[4].mxu0 }
 0x349   : > { %v945_v24 = vpop.f32.mrb[5].mxu0 }
 0x34a   : > { %v947_v50 = vpop.f32.mrb[6].mxu0 }
 0x34b   : > { %v1126_v25 = vpack.c.bf16 %v947_v50, %v943_v21  ;;  %v949_v26 = vpop.f32.mrb[7].mxu0 }
 0x34c   : > { %v1127_v27 = vpack.c.bf16 %v949_v26, %v945_v24 }
 0x34e   : > { %1143 = vmatprep.subr.bf16.mxu1 %v1127_v27 }
 0x34f   : > { %1144 = vmatpush1.bf16.msra.mxu1 %v1126_v25 }
 0x353   : > { %v1026_v3 = vpop.f32.mrb[4].mxu1 }
 0x354   : > { %v1045_v49 = vmul.f32 %v1038_v46, %v1026_v3  ;;  %v1028_v56 = vpop.f32.mrb[5].mxu1 }
 0x355   : > { %v1029_v19 = vpop.f32.mrb[6].mxu1 }
 0x356   : > { %v1046_v59 = vmul.f32 %v1043_v57, %v1029_v19  ;;  %v1031_v62 = vpop.f32.mrb[7].mxu1  ;;  %v1049_v60 = vadd.f32 %v1047_v48, %v1045_v49 }
 0x358   : > { %v1051_v33 = vsel %vm799_vm8, %v1049_v60, -inf  ;;  %v1050_v2 = vadd.f32 %v1048_v58, %v1046_v59 }
 0x359   : > { %1052 = vmax.xlane.f32.xlu1 %v1051_v33 }
 0x35a   : > { %v1054_v63 = vsel %vm799_vm8, %v1050_v2, -inf }
 0x35b   : > { %1055 = vmax.xlane.f32.xlu0 %v1054_v63 }
 0x3e6   : > { %v1053_v0 = vpop.xlane.xlu1 %1052 }
 0x3e7   : > { %v1057_v4 = vsub.f32 %v1049_v60, %v1053_v0 }
 0x3e8   : > { %v1056_v22 = vpop.xlane.xlu0 %1055 }
 0x3e9   : > { %v1059_v17 = vmul.f32 1.442695, %v1057_v4  ;;  %v1058_v23 = vsub.f32 %v1050_v2, %v1056_v22 }
 0x3eb   : > { %1385 = vpow2.f32 %v1059_v17  ;;  %v1061_v6 = vmul.f32 1.442695, %v1058_v23 }
 0x3ed   : > { %1387 = vpow2.f32 %v1061_v6 }
 0x3f5   : > { %v1386_v7 = vpop.eup %1385 }
 0x3f6   : > { %v1063_v8 = vsel %vm799_vm8, %v1386_v7, 0.0 }
 0x3f7   : > { %v1388_v9 = vpop.eup %1387  ;;  %1064 = vadd.xlane.f32.xlu1 %v1063_v8 }
 0x3f8   : > { %v1066_v5 = vsel %vm799_vm8, %v1388_v9, 0.0 }
 0x3f9   : > { %1067 = vadd.xlane.f32.xlu0 %v1066_v5 }
 0x408   : > { %1132 = vperm.xlu1 %1372, %v1128_v51  }
 0x40f   : > { %1137 = vperm.xlu0 %1371, %v1129_v10  }
 0x484   : > { %v1065_v12 = vpop.xlane.xlu1 %1064 }
 0x485   : > { %1389 = vrcp.f32 %v1065_v12 }
 0x486   : > { %v1068_v13 = vpop.xlane.xlu0 %1067 }
 0x487   : > { %1391 = vrcp.f32 %v1068_v13 }
 0x488   : > { %v1133_v36 = vpop.permute.xlu1 %1132 }
 0x48e   : > { %v1138_v37 = vpop.permute.xlu0 %1137 }
 0x48f   : > { %v1390_v47 = vpop.eup %1389 }
 0x490   : > { %v1071_v15 = vmul.f32 %v1390_v47, %v1386_v7 }
 0x491   : > { %v1392_v14 = vpop.eup %1391 }
 0x492   : > { %v1072_v16 = vmul.f32 %v1392_v14, %v1388_v9 }
 0x494   : > { %v1075_v18 = vpack.c.bf16 %v1072_v16, %v1071_v15 }
 0x496   : > { %1315 = vmatpush3.bf16.msra.mxu0 %v1075_v18 }
 0x499   : > { %1317 = vmatmul.mubr.msk.bf16.vlgmr.msra.gmra.mrb[8].mxu0 %vm799_vm8, %v1376_v20 }
 0x56c   : > { %v1118_v28 = vpop.f32.mrb[8].mxu0 }
 0x56d   : > { %v1318_v29 = vpop.f32.mrb[9].mxu0 }
 0x56e   : > { %v1121_v30 = vpop.f32.mrb[10].mxu0 }
 0x56f   : > { %v1125_v61 = vpack.c.bf16 %v1121_v30, %v1118_v28  ;;  %v1319_v31 = vpop.f32.mrb[11].mxu0 }
 0x571   : > { %1304 = vmatmul.mubr.msk.bf16.vlgmr.msra.gmra.mrb[8].mxu1 %vm799_vm8, %v1125_v61 }
 0x644   : > { %v1177_v32 = vpop.f32.mrb[8].mxu1 }
 0x645   : > { %v1178_v53 = vadd.f32 %v1177_v32, %v1133_v36  ;;  %v1179_v54 = vpop.f32.mrb[9].mxu1 }
 0x646   : > { %v1180_v38 = vadd.f32 %v1179_v54, %v1133_v36  ;;  %v1181_v39 = vpop.f32.mrb[10].mxu1 }
 0x647   : > { %1186 = vst [vmem:[%s352_s30] sm:$0xff] %v1178_v53  ;;  %v1182_v34 = vadd.f32 %v1181_v39, %v1138_v37  ;;  %v1183_v35 = vpop.f32.mrb[11].mxu1 }
 0x648   : > { %1187 = vst [vmem:[%s352_s30 + $0x8] sm:$0xff] %v1180_v38  ;;  %v1184_v40 = vadd.f32 %v1183_v35, %v1138_v37 }
 0x649   : > { %1188 = vst [vmem:[%s352_s30 + $0x10] sm:$0xff] %v1182_v34 }
 0x64a   : > { %1189 = vst [vmem:[%s352_s30 + $0x18] sm:$0xff] %v1184_v40 }
 0x64b   : > { %1406 = shalt.err (!%p1403_p3)
}
 0x64c   : > { %s1407_s28 = scalar_lea.hbm %s1870_s21, 512  ;;  %s1411_s18 = scalar_lea.hbm %s1924_s10, 1024 }
 0x64d   : > { %p1408_p4 = scmp.ne.s32.totalorder %s1870_s21, %s1407_s28  ;;  %p1412_p9 = scmp.lt.u32.totalorder %s1870_s21, %s1924_s10 }
 0x64e   : > { %p1413_p10 = scmp.lt.u32.totalorder %s1411_s18, %s1407_s28  ;;  %p1415_p12 = scmp.lt.u32.totalorder %s1407_s28, %s1870_s21 }
 0x64f   : > { %p1409_p7 = pnand %p1408_p4, %p1563_p5 }
 0x650   : > { %p1414_p11 = por %p1413_p10, %p1412_p9 }
 0x651   : > { %p1410_p8 = pneg %p1409_p7 }
 0x652   : > { %p1416_p13 = por %p1415_p12, %p1414_p11 }
 0x654   : > { %p1417_p0 = pnand %p1416_p13, %p1410_p8 }
 0x656   : > { %1420 = shalt.err (!%p1417_p0)
}
 0x657   : > { %s1469_s25 = smov 256   ;;  %s1928_s26 = smov 16  }
 0x658   : > { %1320 = dma.vmem_to_hbm [thread:$0]  (%p1563_p5), %s1865_s11, 512, %s1870_s21, %s1872_s17, %s1469_s25, %s1469_s25, %s1928_s26  }
 0x659 PF: > { %p1326_p1 = scmp.ge.s32.totalorder %s1455_s16, 2  ;;  %s1219_s29 = sand.u32 1, %s1443_s13  }
 0x65a   : > { %s1220_s28 = scalar_lea.sflag [#allocation3], %s1219_s29 }
 0x65b   : > { %p1323_p2 = pnand %p1326_p1, %p1567_p6 }
 0x65d   : > { %1438 = dma.done.wait (!%p1323_p2), %s1220_s28, 512  }
 0x65e   : > { %1440 = vsyncadd (!%p1323_p2), %s1220_s28, 4294966784  ;;  %p20_p3 = scmp.ge.s32.totalorder %s1550_s19, 4   ;;  %s1929_s13 = smov %s1447_s14 }
 0x65f   : > { %s1930_s14 = smov %s1451_s15  ;;  %s1931_s15 = smov %s1561_s22 }
 0x660   : > { %s1932_s16 = smov %s1550_s19  ;;  %22 = sbr.rel (!%p20_p3) target bundleno = 3 (0x3), region = 110 }
 0x667   :  { %1225 = vsyncpa [#allocation3], 1 }
 0x668   :  { %1227 = vsyncpa [#allocation3 + $0x1], 1 }

</bundles_post_ra>
